<compile_context>
chip_gen: v6e
topology: v6e:2x2x1
jax: 0.10.0
libtpu: 0.0.40
codegen_flags: <defaults>
</compile_context>

<pallas_src>
import functools

import jax
import jax.numpy as jnp
from jax.experimental import pallas as pl
from jax.experimental.pallas import tpu as pltpu


# -----------------------------------------------------------------------------
# In-kernel helpers
# -----------------------------------------------------------------------------
def _causal_shift(v, s, seg_pos):
    """Shift v (C, N) right by `s` lanes with zero fill, per L_r segment.

    The lane axis holds B_blk sequences of length L_r laid out back to back;
    `seg_pos` is lane_index % L_r.  Positions whose within-sequence index is
    < s would otherwise receive the tail of the previous sequence, so they are
    masked to zero — exactly the causal left zero-padding of the conv.
    """
    if s == 0:
        return v
    c, n = v.shape
    shifted = jnp.concatenate(
        [jnp.zeros((c, s), v.dtype), v[:, : n - s]], axis=1)
    return jnp.where(seg_pos < s, jnp.zeros_like(shifted), shifted)


def _causal_dilated_conv(v, w_flat, b, *, K, d, seg_pos, tap_accumulate):
    """Causal dilated conv (+bias) of v (Cp_in, N) -> (Cp_out, N) in f32.

    w_flat is (Cp_out, K * Cp_in); column block k pairs with tap k, whose
    input is v shifted right by (K - 1 - k) * d.
    """
    c = v.shape[0]
    if K == 1:
        return jnp.dot(w_flat, v, preferred_element_type=jnp.float32) + b
    if tap_accumulate:
        # K accumulating matmuls: avoids the (K*Cp, N) stacked-RHS transient.
        # Preferred for large channel counts (esp. v7x: 64 MiB VMEM, MRB
        # accumulates in place so split matmuls have no pop penalty).
        acc = None
        for k in range(K):
            vk = _causal_shift(v, (K - 1 - k) * d, seg_pos)
            part = jnp.dot(w_flat[:, k * c:(k + 1) * c], vk,
                           preferred_element_type=jnp.float32)
            acc = part if acc is None else acc + part
        return acc + b
    # im2col: one wide MXU matmul with contraction K*Cp.  Best when channel
    # counts are small and MXU fill/drain overhead dominates.
    stacked = jnp.concatenate(
        [_causal_shift(v, (K - 1 - k) * d, seg_pos) for k in range(K)], axis=0)
    return jnp.dot(w_flat, stacked, preferred_element_type=jnp.float32) + b


# -----------------------------------------------------------------------------
# Pallas kernel
# -----------------------------------------------------------------------------
def _temporal_block_kernel(*refs, K1, d1, K2, d2, L_r, has_downsample,
                           compute_dtype, tap_acc1, tap_acc2):
    if has_downsample:
        x_ref, w1_ref, b1_ref, w2_ref, b2_ref, wds_ref, bds_ref, o_ref = refs
    else:
        x_ref, w1_ref, b1_ref, w2_ref, b2_ref, o_ref = refs
        wds_ref = bds_ref = None

    x_in = x_ref[...]                         # (Cp_in, B_blk*L_r)
    x_c = x_in.astype(compute_dtype)          # MXU / tap-shift operand

    # Within-sequence lane position; built ONCE per grid step and reused by
    # every tap of both convs (JAX does not CSE iota/broadcast).
    n = x_in.shape[1]
    seg_pos = jax.lax.broadcasted_iota(jnp.int32, (1, n), 1) % L_r

    # conv1 -> chomp -> ReLU   (dropout = identity in inference)
    h1 = _causal_dilated_conv(x_c, w1_ref[...], b1_ref[...],
                              K=K1, d=d1, seg_pos=seg_pos,
                              tap_accumulate=tap_acc1)
    h1 = jnp.maximum(h1, 0.0).astype(compute_dtype)

    # conv2 -> chomp -> ReLU   (dropout = identity)
    h2 = _causal_dilated_conv(h1, w2_ref[...], b2_ref[...],
                              K=K2, d=d2, seg_pos=seg_pos,
                              tap_accumulate=tap_acc2)
    h2 = jnp.maximum(h2, 0.0)

    # residual
    if has_downsample:
        res = jnp.dot(wds_ref[...], x_c,
                      preferred_element_type=jnp.float32) + bds_ref[...]
    else:
        res = x_in.astype(jnp.float32)        # identity skip, no matmul

    o_ref[...] = jnp.maximum(h2 + res, 0.0).astype(o_ref.dtype)


# -----------------------------------------------------------------------------
# Wrapper
# -----------------------------------------------------------------------------
def _round_up(n, m):
    return ((n + m - 1) // m) * m


def _vmem_bytes_estimate(*, Cp_in, Cp_h, Cp_out, K1, K2, n_lanes,
                         x_itemsize, out_itemsize, c_itemsize,
                         tap_acc1, tap_acc2, has_downsample):
    """Rough per-grid-step VMEM footprint (double-buffered blocks + transients)."""
    x_blk = Cp_in * n_lanes * x_itemsize
    o_blk = Cp_out * n_lanes * out_itemsize
    w = (Cp_h * K1 * Cp_in + Cp_out * K2 * Cp_h) * c_itemsize
    w += (Cp_h + Cp_out) * 4
    if has_downsample:
        w += Cp_out * Cp_in * c_itemsize + Cp_out * 4
    # in-kernel transients: compute-dtype copies, conv outputs, stacked RHS
    trans = Cp_in * n_lanes * c_itemsize
    trans += Cp_h * n_lanes * (4 + c_itemsize)
    trans += Cp_out * n_lanes * 4 * 2
    trans += (Cp_in if tap_acc1 else K1 * Cp_in) * n_lanes * c_itemsize
    trans += (Cp_h if tap_acc2 else K2 * Cp_h) * n_lanes * c_itemsize
    return 2 * (x_blk + o_blk) + 2 * w + trans


def temporal_block_single(x, params, *, kernel_size, dilation, padding,
                          compute_dtype=jnp.bfloat16, out_dtype=None,
                          residual_f32=True, block_b=None,
                          tap_accumulate=None,
                          vmem_budget_bytes=48 * 2**20):
    """x: (B, C_in, L) float32.  Returns (B, C_out, L) in out_dtype
    (defaults to compute_dtype)."""
    B, C_in, L = x.shape
    K1, K2 = kernel_size
    d1, d2 = dilation
    p1, p2 = padding
    # Causal TCN convention (stride 1); required for residual shapes to match.
    assert p1 == (K1 - 1) * d1 and p2 == (K2 - 1) * d2, "non-causal padding"

    w1, b1, w2, b2, wds, bds = params          # effective (weight-normed) weights
    C_h = w1.shape[0]
    C_out = w2.shape[0]
    has_downsample = wds is not None
    if not has_downsample:
        assert C_in == C_out

    if out_dtype is None:
        out_dtype = compute_dtype
    x_dtype = jnp.float32 if residual_f32 else compute_dtype

    # ---- TPU-friendly padded shapes -----------------------------------------
    # bf16 packs 16 sublanes per vreg -> align channels to 16 so tap-stack
    # concats and bias broadcasts stay tile aligned (8 suffices for f32).
    c_align = 16 if jnp.dtype(compute_dtype).itemsize == 2 else 8
    Cp_in = _round_up(C_in, c_align)
    Cp_h = _round_up(C_h, c_align)
    Cp_out = _round_up(C_out, c_align)
    L_r = _round_up(L, 128)                    # lane-dense time axis
    assert max(p1, p2) < L_r

    # im2col vs per-tap accumulation (auto per conv, overridable)
    if tap_accumulate is None:
        tap_acc1 = K1 * Cp_in > 512
        tap_acc2 = K2 * Cp_h > 512
    else:
        tap_acc1 = tap_acc2 = bool(tap_accumulate)

    # ---- pick the batch block (N = B_blk * L_r lanes per grid step) ---------
    def est(b_blk):
        return _vmem_bytes_estimate(
            Cp_in=Cp_in, Cp_h=Cp_h, Cp_out=Cp_out, K1=K1, K2=K2,
            n_lanes=b_blk * L_r,
            x_itemsize=jnp.dtype(x_dtype).itemsize,
            out_itemsize=jnp.dtype(out_dtype).itemsize,
            c_itemsize=jnp.dtype(compute_dtype).itemsize,
            tap_acc1=tap_acc1, tap_acc2=tap_acc2,
            has_downsample=has_downsample)

    divisors = [dv for dv in range(1, B + 1) if B % dv == 0]  # no batch-pad waste
    max_b = block_b if block_b is not None else max(1, 4096 // L_r)
    cands = [dv for dv in divisors if dv <= max_b] or [1]
    fitting = [dv for dv in cands if est(dv) <= vmem_budget_bytes] or [1]
    multi_step = [dv for dv in fitting if B // dv >= 2]   # keep both v7x TCs busy
    B_blk = max(multi_step) if multi_step else max(fitting)
    n_blk = B_blk * L_r
    grid = (B // B_blk,)
    vmem_limit = int(min(100 * 2**20, max(32 * 2**20, 3 * est(B_blk) // 2)))

    # ---- lane-dense activation layout: (C, B*L_r) ----------------------------
    xp = jnp.pad(x, ((0, 0), (0, Cp_in - C_in), (0, L_r - L)))
    xp = jnp.transpose(xp, (1, 0, 2)).reshape(Cp_in, B * L_r).astype(x_dtype)

    def flat_weight(w, Op, Cp, K):
        # (O, C, K) -> zero-pad -> (Op, K, Cp) -> (Op, K*Cp); column k*Cp + c
        # pairs with tap-block k of the in-kernel shift stack.
        wpad = jnp.pad(w, ((0, Op - w.shape[0]), (0, Cp - w.shape[1]), (0, 0)))
        return jnp.transpose(wpad, (0, 2, 1)).reshape(Op, K * Cp).astype(compute_dtype)

    w1_f = flat_weight(w1, Cp_h, Cp_in, K1)
    w2_f = flat_weight(w2, Cp_out, Cp_h, K2)
    b1_c = jnp.pad(b1, (0, Cp_h - C_h)).reshape(Cp_h, 1).astype(jnp.float32)
    b2_c = jnp.pad(b2, (0, Cp_out - C_out)).reshape(Cp_out, 1).astype(jnp.float32)

    inputs = [xp, w1_f, b1_c, w2_f, b2_c]
    in_specs = [
        pl.BlockSpec((Cp_in, n_blk), lambda i: (0, i)),       # x (lane blocked)
        pl.BlockSpec((Cp_h, K1 * Cp_in), lambda i: (0, 0)),   # w1 (flattened)
        pl.BlockSpec((Cp_h, 1), lambda i: (0, 0)),            # b1
        pl.BlockSpec((Cp_out, K2 * Cp_h), lambda i: (0, 0)),  # w2 (flattened)
        pl.BlockSpec((Cp_out, 1), lambda i: (0, 0)),          # b2
    ]
    if has_downsample:
        wds_c = jnp.pad(wds, ((0, Cp_out - C_out),
                              (0, Cp_in - C_in))).astype(compute_dtype)
        bds_c = jnp.pad(bds, (0, Cp_out - C_out)).reshape(Cp_out, 1).astype(jnp.float32)
        inputs += [wds_c, bds_c]
        in_specs += [pl.BlockSpec((Cp_out, Cp_in), lambda i: (0, 0)),
                     pl.BlockSpec((Cp_out, 1), lambda i: (0, 0))]

    kern = functools.partial(
        _temporal_block_kernel, K1=K1, d1=d1, K2=K2, d2=d2, L_r=L_r,
        has_downsample=has_downsample, compute_dtype=compute_dtype,
        tap_acc1=tap_acc1, tap_acc2=tap_acc2)

    out2d = pl.pallas_call(
        kern,
        out_shape=jax.ShapeDtypeStruct((Cp_out, B * L_r), out_dtype),
        grid=grid,
        in_specs=in_specs,
        out_specs=pl.BlockSpec((Cp_out, n_blk), lambda i: (0, i)),
        compiler_params=pltpu.CompilerParams(
            dimension_semantics=("parallel",),
            vmem_limit_bytes=vmem_limit),
    )(*inputs)

    out = out2d.reshape(Cp_out, B, L_r).transpose(1, 0, 2)
    return out[:, :C_out, :L]


# -----------------------------------------------------------------------------
# Parameter construction (deterministic, weight_norm applied in glue)
# -----------------------------------------------------------------------------
def _weight_norm(v, g):
    # PyTorch weight_norm default dim=0: per-out-channel norm over dims (1,2).
    nrm = jnp.sqrt(jnp.sum(v * v, axis=(1, 2), keepdims=True))
    return g[:, None, None] * v / nrm


def make_params(key, n_inputs, n_outputs, kernel_size):
    ks = jax.random.split(key, 8)
    C_in, C_h = n_inputs
    C_h2, C_out = n_outputs
    K1, K2 = kernel_size

    v1 = 0.01 * jax.random.normal(ks[0], (C_h, C_in, K1), jnp.float32)
    g1 = 1.0 + 0.1 * jax.random.normal(ks[1], (C_h,), jnp.float32)
    b1 = 0.01 * jax.random.normal(ks[2], (C_h,), jnp.float32)

    v2 = 0.01 * jax.random.normal(ks[3], (C_out, C_h2, K2), jnp.float32)
    g2 = 1.0 + 0.1 * jax.random.normal(ks[4], (C_out,), jnp.float32)
    b2 = 0.01 * jax.random.normal(ks[5], (C_out,), jnp.float32)

    if C_in != C_out:
        wds = 0.01 * jax.random.normal(ks[6], (C_out, C_in), jnp.float32)
        bds = 0.01 * jax.random.normal(ks[7], (C_out,), jnp.float32)
    else:
        wds, bds = None, None            # downsample is None -> identity residual

    return (_weight_norm(v1, g1), b1, _weight_norm(v2, g2), b2, wds, bds)


# -----------------------------------------------------------------------------
# Pure-JAX reference (mirrors the PyTorch ops) for validation
# -----------------------------------------------------------------------------
def reference(x, params, *, dilation, padding):
    w1, b1, w2, b2, wds, bds = params
    p1, p2 = padding
    d1, d2 = dilation

    def conv1d(x, w, b, dil, pad):
        y = jax.lax.conv_general_dilated(
            x, w, window_strides=(1,), padding=[(pad, pad)],
            rhs_dilation=(dil,), dimension_numbers=("NCH", "OIH", "NCH"))
        return y + b[None, :, None]

    h = conv1d(x, w1, b1, d1, p1)[:, :, :-p1]                # conv1 + chomp1
    h = jax.nn.relu(h)                                        # relu1 (+dropout=id)
    h = conv1d(h, w2, b2, d2, p2)[:, :, :-p2]                 # conv2 + chomp2
    h = jax.nn.relu(h)                                        # relu2 (+dropout=id)
    if wds is None:
        res = x
    else:
        res = jnp.einsum("oi,bil->bol", wds, x) + bds[None, :, None]
    return jax.nn.relu(h + res)


# -----------------------------------------------------------------------------
if __name__ == "__main__":
    key = jax.random.PRNGKey(0)
    kx1, kp1, kx2, kp2 = jax.random.split(key, 4)

    kernel_size = (3, 3)
    dilation = (1, 2)
    padding = ((kernel_size[0] - 1) * dilation[0],
               (kernel_size[1] - 1) * dilation[1])            # (2, 4)
    L = 16

    # ---- Config A: C_in != C_out (1x1 downsample on skip), B=2, B_blk=1 ----
    B_a = 2
    n_inputs_a, n_outputs_a = (4, 8), (8, 8)
    x_a = jax.random.normal(kx1, (B_a, n_inputs_a[0], L), jnp.float32)
    params_a = make_params(kp1, n_inputs_a, n_outputs_a, kernel_size)
    ref_a = reference(x_a, params_a, dilation=dilation, padding=padding)

    # f32 compute, im2col path: strict check.
    out_f32 = temporal_block_single(x_a, params_a, kernel_size=kernel_size,
                                    dilation=dilation, padding=padding,
                                    compute_dtype=jnp.float32)
    out_f32 = jax.block_until_ready(out_f32)
    assert out_f32.shape == (B_a, n_outputs_a[-1], L), out_f32.shape
    assert jnp.allclose(out_f32, ref_a, rtol=1e-3, atol=1e-3), \
        float(jnp.max(jnp.abs(out_f32 - ref_a)))

    # f32 compute, per-tap accumulation path (large-Cp / v7x variant): strict.
    out_tap = temporal_block_single(x_a, params_a, kernel_size=kernel_size,
                                    dilation=dilation, padding=padding,
                                    compute_dtype=jnp.float32,
                                    tap_accumulate=True)
    out_tap = jax.block_until_ready(out_tap)
    assert jnp.allclose(out_tap, ref_a, rtol=1e-3, atol=1e-3), \
        float(jnp.max(jnp.abs(out_tap - ref_a)))

    # bf16 MXU operands + bf16 output (default fast path): loose check.
    out_bf16 = temporal_block_single(x_a, params_a, kernel_size=kernel_size,
                                     dilation=dilation, padding=padding,
                                     compute_dtype=jnp.bfloat16)
    out_bf16 = jax.block_until_ready(out_bf16)
    assert out_bf16.dtype == jnp.bfloat16
    assert jnp.allclose(out_bf16.astype(jnp.float32), ref_a,
                        rtol=5e-2, atol=5e-2), \
        float(jnp.max(jnp.abs(out_bf16.astype(jnp.float32) - ref_a)))

    # ---- Config B: C_in == C_out (identity residual), B=4 -> B_blk=2 -------
    # Exercises folding multiple sequences into one wide matmul block and the
    # cross-sequence causal-shift masking.
    B_b = 4
    n_inputs_b, n_outputs_b = (8, 8), (8, 8)
    x_b = jax.random.normal(kx2, (B_b, n_inputs_b[0], L), jnp.float32)
    params_b = make_params(kp2, n_inputs_b, n_outputs_b, kernel_size)
    ref_b = reference(x_b, params_b, dilation=dilation, padding=padding)

    out_b = temporal_block_single(x_b, params_b, kernel_size=kernel_size,
                                  dilation=dilation, padding=padding,
                                  compute_dtype=jnp.float32)
    out_b = jax.block_until_ready(out_b)
    assert out_b.shape == (B_b, n_outputs_b[-1], L), out_b.shape
    assert jnp.allclose(out_b, ref_b, rtol=1e-3, atol=1e-3), \
        float(jnp.max(jnp.abs(out_b - ref_b)))

    print("KERNEL_OK")
</pallas_src>

<mosaic_0001>
module attributes {stable_mosaic.version = 11 : i64} {
  func.func @_temporal_block_kernel(%arg0: i32, %arg1: memref<8x128xf32, #tpu.memory_space<vmem>>, %arg2: memref<8x24xf32, #tpu.memory_space<vmem>>, %arg3: memref<8x1xf32, #tpu.memory_space<vmem>>, %arg4: memref<8x24xf32, #tpu.memory_space<vmem>>, %arg5: memref<8x1xf32, #tpu.memory_space<vmem>>, %arg6: memref<8x8xf32, #tpu.memory_space<vmem>>, %arg7: memref<8x1xf32, #tpu.memory_space<vmem>>, %arg8: memref<8x128xf32, #tpu.memory_space<vmem>>) attributes {dimension_semantics = [#tpu.dimension_semantics<parallel>], iteration_bounds = array<i64: 2>, scalar_prefetch = 0 : i64, scratch_operands = 0 : i64, tpu.core_type = #tpu.core_type<tc>, window_params = [{transform_indices = @transform_0, window_bounds = array<i64: 8, 128>}, {pipeline_mode = #tpu.pipeline_mode<synchronous>, transform_indices = @transform_1, window_bounds = array<i64: 8, 24>}, {pipeline_mode = #tpu.pipeline_mode<synchronous>, transform_indices = @transform_2, window_bounds = array<i64: 8, 1>}, {pipeline_mode = #tpu.pipeline_mode<synchronous>, transform_indices = @transform_3, window_bounds = array<i64: 8, 24>}, {pipeline_mode = #tpu.pipeline_mode<synchronous>, transform_indices = @transform_4, window_bounds = array<i64: 8, 1>}, {pipeline_mode = #tpu.pipeline_mode<synchronous>, transform_indices = @transform_5, window_bounds = array<i64: 8, 8>}, {pipeline_mode = #tpu.pipeline_mode<synchronous>, transform_indices = @transform_6, window_bounds = array<i64: 8, 1>}, {transform_indices = @transform_7, window_bounds = array<i64: 8, 128>}]} {
    %c0 = arith.constant 0 : index
    %c0_0 = arith.constant 0 : index
    %0 = vector.load %arg1[%c0, %c0_0] : memref<8x128xf32, #tpu.memory_space<vmem>>, vector<8x128xf32>
    %1 = tpu.iota {dimensions = array<i32: 1>} : vector<1x128xi32>
    %c128_i32 = arith.constant 128 : i32
    %c0_i32 = arith.constant 0 : i32
    %2 = arith.cmpi eq, %c128_i32, %c0_i32 : i32
    %c1_i32 = arith.constant 1 : i32
    %3 = arith.select %2, %c1_i32, %c128_i32 : i32
    %4 = vector.broadcast %3 : i32 to vector<1x128xi32>
    %5 = arith.remsi %1, %4 : vector<1x128xi32>
    %c0_i32_1 = arith.constant 0 : i32
    %6 = vector.broadcast %c0_i32_1 : i32 to vector<1x128xi32>
    %7 = arith.cmpi ne, %5, %6 : vector<1x128xi32>
    %c0_i32_2 = arith.constant 0 : i32
    %8 = vector.broadcast %c0_i32_2 : i32 to vector<1x128xi32>
    %9 = arith.cmpi slt, %5, %8 : vector<1x128xi32>
    %c0_i32_3 = arith.constant 0 : i32
    %10 = arith.cmpi slt, %3, %c0_i32_3 : i32
    %11 = vector.broadcast %10 : i1 to vector<1x128xi1>
    %12 = vector.broadcast %11 : vector<1x128xi1> to vector<1x128xi1>
    %13 = arith.xori %9, %12 : vector<1x128xi1>
    %14 = arith.andi %13, %7 : vector<1x128xi1>
    %15 = vector.broadcast %3 : i32 to vector<1x128xi32>
    %16 = arith.addi %5, %15 : vector<1x128xi32>
    %17 = arith.select %14, %16, %5 : vector<1x128xi1>, vector<1x128xi32>
    %c0_4 = arith.constant 0 : index
    %c0_5 = arith.constant 0 : index
    %18 = vector.load %arg2[%c0_4, %c0_5] : memref<8x24xf32, #tpu.memory_space<vmem>>, vector<8x24xf32>
    %c0_6 = arith.constant 0 : index
    %c0_7 = arith.constant 0 : index
    %19 = vector.load %arg3[%c0_6, %c0_7] : memref<8x1xf32, #tpu.memory_space<vmem>>, vector<8x1xf32>
    %cst = arith.constant 0.000000e+00 : f32
    %20 = vector.broadcast %cst : f32 to vector<8x2xf32>
    %21 = vector.extract_strided_slice %0 {offsets = [0, 0], sizes = [8, 126], strides = [1, 1]} : vector<8x128xf32> to vector<8x126xf32>
    %22 = tpu.concatenate %20, %21 in 1 : vector<8x2xf32>, vector<8x126xf32> -> vector<8x128xf32>
    %c2_i32 = arith.constant 2 : i32
    %23 = vector.broadcast %c2_i32 : i32 to vector<1x128xi32>
    %24 = arith.cmpi slt, %17, %23 : vector<1x128xi32>
    %cst_8 = arith.constant 0.000000e+00 : f32
    %25 = vector.broadcast %cst_8 : f32 to vector<8x128xf32>
    %26 = vector.shape_cast %24 : vector<1x128xi1> to vector<1x128xi1>
    %27 = vector.broadcast %26 : vector<1x128xi1> to vector<8x128xi1>
    %28 = arith.select %27, %25, %22 : vector<8x128xi1>, vector<8x128xf32>
    %cst_9 = arith.constant 0.000000e+00 : f32
    %29 = vector.broadcast %cst_9 : f32 to vector<8x1xf32>
    %30 = vector.extract_strided_slice %0 {offsets = [0, 0], sizes = [8, 127], strides = [1, 1]} : vector<8x128xf32> to vector<8x127xf32>
    %31 = tpu.concatenate %29, %30 in 1 : vector<8x1xf32>, vector<8x127xf32> -> vector<8x128xf32>
    %c1_i32_10 = arith.constant 1 : i32
    %32 = vector.broadcast %c1_i32_10 : i32 to vector<1x128xi32>
    %33 = arith.cmpi slt, %17, %32 : vector<1x128xi32>
    %cst_11 = arith.constant 0.000000e+00 : f32
    %34 = vector.broadcast %cst_11 : f32 to vector<8x128xf32>
    %35 = vector.shape_cast %33 : vector<1x128xi1> to vector<1x128xi1>
    %36 = vector.broadcast %35 : vector<1x128xi1> to vector<8x128xi1>
    %37 = arith.select %36, %34, %31 : vector<8x128xi1>, vector<8x128xf32>
    %38 = tpu.concatenate %28, %37, %0 in 0 : vector<8x128xf32>, vector<8x128xf32>, vector<8x128xf32> -> vector<24x128xf32>
    %cst_12 = arith.constant dense<0.000000e+00> : vector<8x128xf32>
    %39 = tpu.matmul %18, %38, %cst_12 {dimension_numbers = #tpu.dot_dimension_numbers<[1], [0], [0], [1], [0, 0, 1, 1], [], []>} : vector<8x24xf32>, vector<24x128xf32>, vector<8x128xf32> -> vector<8x128xf32>
    %40 = vector.broadcast %19 : vector<8x1xf32> to vector<8x128xf32>
    %41 = arith.addf %39, %40 : vector<8x128xf32>
    %cst_13 = arith.constant 0.000000e+00 : f32
    %42 = vector.broadcast %cst_13 : f32 to vector<8x128xf32>
    %43 = arith.maximumf %41, %42 : vector<8x128xf32>
    %c0_14 = arith.constant 0 : index
    %c0_15 = arith.constant 0 : index
    %44 = vector.load %arg4[%c0_14, %c0_15] : memref<8x24xf32, #tpu.memory_space<vmem>>, vector<8x24xf32>
    %c0_16 = arith.constant 0 : index
    %c0_17 = arith.constant 0 : index
    %45 = vector.load %arg5[%c0_16, %c0_17] : memref<8x1xf32, #tpu.memory_space<vmem>>, vector<8x1xf32>
    %cst_18 = arith.constant 0.000000e+00 : f32
    %46 = vector.broadcast %cst_18 : f32 to vector<8x4xf32>
    %47 = vector.extract_strided_slice %43 {offsets = [0, 0], sizes = [8, 124], strides = [1, 1]} : vector<8x128xf32> to vector<8x124xf32>
    %48 = tpu.concatenate %46, %47 in 1 : vector<8x4xf32>, vector<8x124xf32> -> vector<8x128xf32>
    %c4_i32 = arith.constant 4 : i32
    %49 = vector.broadcast %c4_i32 : i32 to vector<1x128xi32>
    %50 = arith.cmpi slt, %17, %49 : vector<1x128xi32>
    %cst_19 = arith.constant 0.000000e+00 : f32
    %51 = vector.broadcast %cst_19 : f32 to vector<8x128xf32>
    %52 = vector.shape_cast %50 : vector<1x128xi1> to vector<1x128xi1>
    %53 = vector.broadcast %52 : vector<1x128xi1> to vector<8x128xi1>
    %54 = arith.select %53, %51, %48 : vector<8x128xi1>, vector<8x128xf32>
    %cst_20 = arith.constant 0.000000e+00 : f32
    %55 = vector.broadcast %cst_20 : f32 to vector<8x2xf32>
    %56 = vector.extract_strided_slice %43 {offsets = [0, 0], sizes = [8, 126], strides = [1, 1]} : vector<8x128xf32> to vector<8x126xf32>
    %57 = tpu.concatenate %55, %56 in 1 : vector<8x2xf32>, vector<8x126xf32> -> vector<8x128xf32>
    %c2_i32_21 = arith.constant 2 : i32
    %58 = vector.broadcast %c2_i32_21 : i32 to vector<1x128xi32>
    %59 = arith.cmpi slt, %17, %58 : vector<1x128xi32>
    %cst_22 = arith.constant 0.000000e+00 : f32
    %60 = vector.broadcast %cst_22 : f32 to vector<8x128xf32>
    %61 = vector.shape_cast %59 : vector<1x128xi1> to vector<1x128xi1>
    %62 = vector.broadcast %61 : vector<1x128xi1> to vector<8x128xi1>
    %63 = arith.select %62, %60, %57 : vector<8x128xi1>, vector<8x128xf32>
    %64 = tpu.concatenate %54, %63, %43 in 0 : vector<8x128xf32>, vector<8x128xf32>, vector<8x128xf32> -> vector<24x128xf32>
    %cst_23 = arith.constant dense<0.000000e+00> : vector<8x128xf32>
    %65 = tpu.matmul %44, %64, %cst_23 {dimension_numbers = #tpu.dot_dimension_numbers<[1], [0], [0], [1], [0, 0, 1, 1], [], []>} : vector<8x24xf32>, vector<24x128xf32>, vector<8x128xf32> -> vector<8x128xf32>
    %66 = vector.broadcast %45 : vector<8x1xf32> to vector<8x128xf32>
    %67 = arith.addf %65, %66 : vector<8x128xf32>
    %cst_24 = arith.constant 0.000000e+00 : f32
    %68 = vector.broadcast %cst_24 : f32 to vector<8x128xf32>
    %69 = arith.maximumf %67, %68 : vector<8x128xf32>
    %c0_25 = arith.constant 0 : index
    %c0_26 = arith.constant 0 : index
    %70 = vector.load %arg6[%c0_25, %c0_26] : memref<8x8xf32, #tpu.memory_space<vmem>>, vector<8x8xf32>
    %cst_27 = arith.constant dense<0.000000e+00> : vector<8x128xf32>
    %71 = tpu.matmul %70, %0, %cst_27 {dimension_numbers = #tpu.dot_dimension_numbers<[1], [0], [0], [1], [0, 0, 1, 1], [], []>} : vector<8x8xf32>, vector<8x128xf32>, vector<8x128xf32> -> vector<8x128xf32>
    %c0_28 = arith.constant 0 : index
    %c0_29 = arith.constant 0 : index
    %72 = vector.load %arg7[%c0_28, %c0_29] : memref<8x1xf32, #tpu.memory_space<vmem>>, vector<8x1xf32>
    %73 = vector.broadcast %72 : vector<8x1xf32> to vector<8x128xf32>
    %74 = arith.addf %71, %73 : vector<8x128xf32>
    %75 = arith.addf %69, %74 : vector<8x128xf32>
    %cst_30 = arith.constant 0.000000e+00 : f32
    %76 = vector.broadcast %cst_30 : f32 to vector<8x128xf32>
    %77 = arith.maximumf %75, %76 : vector<8x128xf32>
    %c0_31 = arith.constant 0 : index
    %c0_32 = arith.constant 0 : index
    %78 = vector.load %arg8[%c0_31, %c0_32] : memref<8x128xf32, #tpu.memory_space<vmem>>, vector<8x128xf32>
    tpu.vector_store %arg8[%c0_31, %c0_32], %77 {strides = array<i32>} : memref<8x128xf32, #tpu.memory_space<vmem>>, vector<8x128xf32>,
    return
  }
  func.func @transform_0(%arg0: i32) -> (i32, i32) {
    %c0_i32 = arith.constant 0 : i32
    %c0_i32_0 = arith.constant 0 : i32
    return %c0_i32, %arg0 : i32, i32
  }
  func.func @transform_1(%arg0: i32) -> (i32, i32) {
    %c0_i32 = arith.constant 0 : i32
    %c0_i32_0 = arith.constant 0 : i32
    %c0_i32_1 = arith.constant 0 : i32
    return %c0_i32, %c0_i32_0 : i32, i32
  }
  func.func @transform_2(%arg0: i32) -> (i32, i32) {
    %c0_i32 = arith.constant 0 : i32
    %c0_i32_0 = arith.constant 0 : i32
    %c0_i32_1 = arith.constant 0 : i32
    return %c0_i32, %c0_i32_0 : i32, i32
  }
  func.func @transform_3(%arg0: i32) -> (i32, i32) {
    %c0_i32 = arith.constant 0 : i32
    %c0_i32_0 = arith.constant 0 : i32
    %c0_i32_1 = arith.constant 0 : i32
    return %c0_i32, %c0_i32_0 : i32, i32
  }
  func.func @transform_4(%arg0: i32) -> (i32, i32) {
    %c0_i32 = arith.constant 0 : i32
    %c0_i32_0 = arith.constant 0 : i32
    %c0_i32_1 = arith.constant 0 : i32
    return %c0_i32, %c0_i32_0 : i32, i32
  }
  func.func @transform_5(%arg0: i32) -> (i32, i32) {
    %c0_i32 = arith.constant 0 : i32
    %c0_i32_0 = arith.constant 0 : i32
    %c0_i32_1 = arith.constant 0 : i32
    return %c0_i32, %c0_i32_0 : i32, i32
  }
  func.func @transform_6(%arg0: i32) -> (i32, i32) {
    %c0_i32 = arith.constant 0 : i32
    %c0_i32_0 = arith.constant 0 : i32
    %c0_i32_1 = arith.constant 0 : i32
    return %c0_i32, %c0_i32_0 : i32, i32
  }
  func.func @transform_7(%arg0: i32) -> (i32, i32) {
    %c0_i32 = arith.constant 0 : i32
    %c0_i32_0 = arith.constant 0 : i32
    return %c0_i32, %arg0 : i32, i32
  }
}

</mosaic_0001>

<bundles_post_ra>
// kernel: tpu_custom_call.1
= control target key start
LH: loop header
LB: loop body
LE: loop exit
PB: predicated region body
PF: predicated region fallthrough
CT: control target
= control target key end

     0   :  { %12 = vsyncpa [#allocation3], 0  ;;  %s1066_s0 = inlined_call_operand.vmem [shape: f32[8,256], index: 0, kind: input, shape index: {}]   ;;  %s1067_s1 = inlined_call_operand.vmem [shape: f32[8,24], index: 1, kind: input, shape index: {}]   ;;  %s1068_s2 = inlined_call_operand.vmem [shape: f32[8,1], index: 2, kind: input, shape index: {}]   ;;  %s1069_s3 = inlined_call_operand.vmem [shape: f32[8,24], index: 3, kind: input, shape index: {}]   ;;  %s1070_s4 = inlined_call_operand.vmem [shape: f32[8,1], index: 4, kind: input, shape index: {}]   ;;  %s1071_s5 = inlined_call_operand.hbm [shape: f32[8,8], index: 5, kind: input, shape index: {}]   ;;  %s1072_s6 = inlined_call_operand.vmem [shape: f32[8,1], index: 6, kind: input, shape index: {}]   ;;  %s1073_s7 = inlined_call_operand.hbm [shape: f32[8,256], index: 7, kind: output, shape index: {}]  }
   0x1   :  { %13 = vsyncpa [#allocation4], 0 }
   0x2   :  { %15 = vsyncpa [#allocation4 + $0x1], 0  ;;  %s925_s24 = smov 0   ;;  %s927_s25 = smov 0  }
   0x3   :  { %s929_s26 = smov 0   ;;  %s931_s27 = smov 0  }
   0x4 LB: > { %s946_s28 = sadd.s32 4294967295, %s875_s27   ;;  %s668_s29 = sadd.s32 4294967294, %s875_s27   ;;  %s875_s27 = sphi %s931_s27, %s1081_s27   ;;  %s871_s26 = sphi %s929_s26, %s1080_s26   ;;  %s867_s25 = sphi %s927_s25, %s1079_s25   ;;  %s863_s24 = sphi %s925_s24, %s1078_s24  }
   0x5   : > { %s950_s30 = sadd.s32 1, %s875_s27   ;;  %s180_s8 = sadd.s32 1, %s871_s26 }
   0x6   : > { %s177_s9 = ssub.s32 %s875_s27, %s950_s30  ;;  %p190_p0 = scmp.ne.s32.totalorder %s871_s26, %s867_s25 }
   0x7   : > { %p178_p1 = scmp.eq.s32.totalorder %s177_s9, 0  ;;  %p191_p2 = scmp.eq.s32.totalorder %s946_s28, 1 }
   0x8   : > { %p196_p3 = scmp.ne.s32.totalorder %s867_s25, %s863_s24  ;;  %p197_p4 = scmp.eq.s32.totalorder %s668_s29, 1 }
   0x9   : > { %s961_s10 = scalar_select %p178_p1, %s871_s26, %s180_s8  }
   0xa   : > { %p963_p5 = por %p191_p2, %p190_p0  ;;  %p967_p6 = por %p197_p4, %p196_p3 }
   0xb   : > { %p669_p7 = scmp.ge.s32.totalorder %s875_s27, 1  ;;  %p204_p8 = scmp.lt.s32.totalorder %s875_s27, 3 }
   0xc   : > { %s1075_s12 = scalar_select %p967_p6, 1, 0 }
   0xd   : > { %p741_p9 = scmp.eq.s32.totalorder %s946_s28, 0  ;;  %p974_p10 = pnand %p669_p7, %p204_p8 }
   0xe   : > { %s877_s14 = smov [#allocation2]  }
   0xf   : > { %s229_s15 = sshll.u32 %s877_s14, 4  ;;  %p733_p11 = pneg %p974_p10  ;;  %s230_s15 = int_to_ptr.vmem [resolvable:$true] %s229_s15 }
  0x10   : > { %s796_s16 = scalar_lea.vmem %s230_s15, 128  ;;  %p804_p3 = scmp.lt.s32.totalorder %s230_s15, %s230_s15 }
  0x11   : > { %p734_p12 = pnand %p741_p9, %p733_p11  ;;  %p797_p0 = scmp.ne.s32.totalorder %s230_s15, %s796_s16 }
  0x12   : > { %p805_p4 = scmp.lt.s32.totalorder %s796_s16, %s796_s16 }
  0x13   : > { %p787_p13 = pneg %p734_p12 }
  0x14   : > { %p806_p6 = por %p805_p4, %p804_p3 }
  0x15   : > { %p799_p1 = pnand %p797_p0, %p787_p13 }
  0x17   : > { %p800_p2 = pneg %p799_p1 }
  0x19   : > { %p807_p7 = pnand %p806_p6, %p800_p2 }
  0x1b   : > { %810 = shalt.err (!%p807_p7)
}
  0x1c   : > { %736 = dma.hbm_to_vmem [thread:$0]  (!%p734_p12), %s1071_s5, 128, %s230_s15, [#allocation3]  }
  0x1d   : > { %252 = sbr.rel (%p974_p10) target bundleno = 693 (0x2b5), region = 48 }
  0x22   : > { %854 = dma.done.wait (%p741_p9), [#allocation3], 128  }
  0x23   : > { %856 = vsyncadd (%p741_p9), [#allocation3], 4294967168  ;;  %p283_p8 = scmp.lt.s32.totalorder %s946_s28, 1  ;;  %v878_v0 = vmov 0.0   ;;  %vm879_vm0 = vmmov 0   ;;  %v880_v1 = vmov 0   ;;  %v288_v4 = vlaneseq }
  0x24   : > { %704 = vmatprep.subr.mxu0 %v878_v0  ;;  %713 = vmatprep.subr.mxu1 %v878_v0  ;;  %v303_v3 = vld [vmem:[%s1068_s2] sm:$0xff]  ;;  %s881_s9 = smov 1   ;;  %s882_s13 = smov 2   ;;  %vm317_vm1 = vcmask 7168   ;;  %vm308_vm3 = vcmask 15360   ;;  %vm328_vm5 = vcmask 195584  }
  0x25   : > { %s284_s19 = scalar_select %p283_p8, %s946_s28, 1  ;;  %710 = vmatprep.mubr.msk.f32.mxu0 %vm879_vm0, %v878_v0  ;;  %783 = vset.pattern.permute.xlu1 %v880_v1  ;;  %v289_v5 = vand.u32 127, %v288_v4  ;;  %v302_v9 = vld [vmem:[%s1067_s1] sm:$0xff]  ;;  %vm506_vm6 = vcmask 64512   ;;  %vm409_vm7 = vcmask 31744  }
  0x26   : > { %719 = vmatprep.mubr.msk.f32.mxu1 %vm879_vm0, %v878_v0  ;;  %784 = vset.pattern.permute.xlu0 %v880_v1  ;;  %v499_v11 = vld [vmem:[#allocation2] sm:$0xff]  ;;  %s883_s16 = smov 4   ;;  %s688_s8 = sshll.u32 %s946_s28, 7 }
  0x27   : > { %s675_s20 = sshll.u32 %s284_s19, 3  ;;  %325 = vperm.xlu1 %783, %v303_v3   ;;  %vm691_vm2 = vcmp.ge.s32.totalorder %v289_v5, 1  ;;  %vm693_vm4 = vcmp.ge.s32.totalorder %v289_v5, 2  ;;  %v404_v17 = vld [vmem:[%s1070_s4] sm:$0xff]  ;;  %vm692_vm8 = vcmp.ge.s32.totalorder %v289_v5, 4  ;;  %s884_s19 = smov [#allocation5]  }
  0x28   : > { %s286_s23 = scalar_lea.vmem %s1066_s0, %s675_s20  ;;  %v500_v18 = vld [vmem:[%s1072_s6] sm:$0xff]  ;;  %s815_s20 = sshll.u32 %s884_s19, 4  ;;  %s816_s20 = int_to_ptr.vmem [resolvable:$false] %s815_s20 }
  0x29   : > { %v287_v2 = vld [vmem:[%s286_s23] sm:$0xff]  ;;  %s280_s23 = sand.u32 1, %s867_s25   ;;  %s817_s28 = scalar_lea.vmem %s816_s20, 256 }
  0x2a   : > { %314 = vrot.lane.b32.xlu0 %v287_v2, %s881_s9  ;;  %705 = vmatpush3.msra.mxu0 %v287_v2  ;;  %v403_v22 = vld [vmem:[%s1069_s3] sm:$0xff]  ;;  %s674_s29 = sshll.u32 %s280_s23, 3  ;;  %s584_s17 = scalar_lea.sflag [#allocation4], %s280_s23 }
  0x2b   : > { %706 = vmatprep.subr.mxu0 %v878_v0  ;;  %s282_s9 = scalar_lea.vmem [#allocation5], %s674_s29 }
  0x2e   : > { %305 = vrot.lane.b32.xlu0 %v287_v2, %s882_s13 }
  0x9c   : > { %v315_v6 = vpop.permute.xlu0 %314 }
  0x9d   : > { %v318_v7 = vsel %vm317_vm1, 0.0, %v315_v6 }
  0x9e   : > { %707 = vmatpush3.msk.msra.mxu0 %vm691_vm2, %v318_v7 }
  0x9f   : > { %708 = vmatprep.subr.mxu0 %v878_v0 }
  0xa0   : > { %v306_v8 = vpop.permute.xlu0 %305 }
  0xa1   : > { %v309_v10 = vsel %vm308_vm3, 0.0, %v306_v8 }
  0xa2   : > { %709 = vmatpush3.msk.msra.mxu0 %vm693_vm4, %v309_v10  ;;  %v326_v12 = vpop.permute.xlu1 %325 }
  0xa3   : > { %711 = vmatmul.mubr.msk.f32.vlgmr.msra.gmra.mxu0 %vm328_vm5, %v302_v9  ;;  %722 = vmatprep.subr.mxu0 %v878_v0 }
  0xa4   : > { %723 = vmatpush3.msra.mxu0 %v287_v2  ;;  %724 = vmatprep.mubr.msk.f32.mxu0 %vm879_vm0, %v878_v0 }
  0xa7   : > { %725 = vmatmul.mubr.msk.f32.vlgmr.msra.gmra.mxu0 %vm506_vm6, %v499_v11 }
 0x163   : > { %v398_v13 = vpop.f32.mrf.mxu0 }
 0x164   : > { %v399_v14 = vadd.f32 %v398_v13, %v326_v12 }
 0x165   : > { %v712_v15 = vpop.f32.mrf.mxu0 }
 0x166   : > { %v402_v16 = vmax.f32 %v399_v14, 0.0 }
 0x167   : > { %v576_v24 = vpop.f32.mrf.mxu0 }
 0x168   : > { %406 = vrot.lane.b32.xlu0 %v402_v16, %s883_s16  ;;  %415 = vrot.lane.b32.xlu1 %v402_v16, %s882_s13  ;;  %s597_s13 = sshll.u32 %s282_s9, 4  ;;  %s595_s16 = scalar_lea.hbm %s1073_s7, %s688_s8  ;;  %s598_s13 = int_to_ptr.vmem [resolvable:$true] %s597_s13 }
 0x169   : > { %714 = vmatpush3.msra.mxu1 %v402_v16  ;;  %v726_v25 = vpop.f32.mrf.mxu0  ;;  %s811_s18 = scalar_lea.vmem %s598_s13, 128  ;;  %p818_p11 = scmp.lt.s32.totalorder %s598_s13, %s816_s20 }
 0x16a   : > { %715 = vmatprep.subr.mxu1 %v878_v0  ;;  %p812_p6 = scmp.ne.s32.totalorder %s598_s13, %s811_s18  ;;  %p819_p12 = scmp.lt.s32.totalorder %s817_s28, %s811_s18 }
 0x16c   : > { %422 = vperm.xlu1 %783, %v404_v17   ;;  %503 = vperm.xlu0 %784, %v500_v18   ;;  %p813_p9 = pnand %p812_p6, %p963_p5  ;;  %p820_p13 = por %p819_p12, %p818_p11 }
 0x16e   : > { %p814_p10 = pneg %p813_p9 }
 0x170   : > { %p821_p0 = pnand %p820_p13, %p814_p10 }
 0x1da   : > { %v407_v19 = vpop.permute.xlu0 %406  ;;  %v416_v20 = vpop.permute.xlu1 %415 }
 0x1db   : > { %v418_v21 = vsel %vm308_vm3, 0.0, %v416_v20  ;;  %v410_v23 = vsel %vm409_vm7, 0.0, %v407_v19 }
 0x1dc   : > { %716 = vmatpush3.msk.msra.mxu1 %vm693_vm4, %v418_v21 }
 0x1dd   : > { %717 = vmatprep.subr.mxu1 %v878_v0 }
 0x1de   : > { %718 = vmatpush3.msk.msra.mxu1 %vm692_vm8, %v410_v23 }
 0x1df   : > { %720 = vmatmul.mubr.msk.f32.vlgmr.msra.gmra.mxu1 %vm328_vm5, %v403_v22 }
 0x1e7   : > { %v504_v26 = vpop.permute.xlu0 %503  ;;  %v423_v27 = vpop.permute.xlu1 %422 }
 0x1e8   : > { %v577_v30 = vadd.f32 %v576_v24, %v504_v26 }
 0x29f   : > { %v494_v28 = vpop.f32.mrf.mxu1 }
 0x2a0   : > { %v495_v29 = vadd.f32 %v494_v28, %v423_v27 }
 0x2a1   : > { %v721_v31 = vpop.f32.mrf.mxu1 }
 0x2a2   : > { %v498_v32 = vmax.f32 %v495_v29, 0.0 }
 0x2a4   : > { %v580_v33 = vadd.f32 %v577_v30, %v498_v32 }
 0x2a6   : > { %v581_v34 = vmax.f32 %v580_v33, 0.0 }
 0x2a8   : > { %582 = vst [vmem:[%s282_s9] sm:$0xff] %v581_v34 }
 0x2a9   : > { %824 = shalt.err (!%p821_p0)
}
 0x2aa   : > { %s825_s21 = scalar_lea.hbm %s595_s16, 128  ;;  %s829_s29 = scalar_lea.hbm %s1073_s7, 256 }
 0x2ab   : > { %p826_p1 = scmp.ne.s32.totalorder %s595_s16, %s825_s21  ;;  %p830_p4 = scmp.lt.s32.totalorder %s595_s16, %s1073_s7 }
 0x2ac   : > { %p831_p7 = scmp.lt.s32.totalorder %s829_s29, %s825_s21 }
 0x2ad   : > { %p827_p2 = pnand %p826_p1, %p963_p5 }
 0x2ae   : > { %p832_p8 = por %p831_p7, %p830_p4 }
 0x2af   : > { %p828_p3 = pneg %p827_p2 }
 0x2b1   : > { %p833_p6 = pnand %p832_p8, %p828_p3 }
 0x2b3   : > { %836 = shalt.err (!%p833_p6)
}
 0x2b4   : > { %731 = dma.vmem_to_hbm [thread:$0]  (%p963_p5), %s598_s13, 128, %s595_s16, %s584_s17  }
 0x2b5 PF: > { %p743_p9 = scmp.ge.s32.totalorder %s875_s27, 2  ;;  %s609_s14 = sand.u32 1, %s863_s24  }
 0x2b6   : > { %p1077_p10 = scmp.ne.s32.totalorder %s1075_s12, 0  ;;  %s610_s15 = scalar_lea.sflag [#allocation4], %s609_s14 }
 0x2b8   : > { %p738_p11 = pnand %p743_p9, %p1077_p10 }
 0x2ba   : > { %p739_p12 = pneg %p738_p11 }
 0x2bc   : > { %858 = dma.done.wait (%p739_p12), %s610_s15, 128  }
 0x2bd   : > { %860 = vsyncadd (%p739_p12), %s610_s15, 4294967168  ;;  %p18_p13 = scmp.ge.s32.totalorder %s950_s30, 4   ;;  %s1078_s24 = smov %s867_s25 }
 0x2be   : > { %s1079_s25 = smov %s871_s26  ;;  %s1080_s26 = smov %s961_s10 }
 0x2bf   : > { %s1081_s27 = smov %s950_s30  ;;  %20 = sbr.rel (!%p18_p13) target bundleno = 4 (0x4), region = 88 }
 0x2c4   :  { %615 = vsyncpa [#allocation3], 1 }
 0x2c5   :  { %617 = vsyncpa [#allocation3 + $0x1], 1 }
 0x2c6   :  { %618 = vsyncpa [#allocation4], 1 }
 0x2c7   :  { %620 = vsyncpa [#allocation4 + $0x1], 1 }

</bundles_post_ra>
